<compile_context>
chip_gen: v6e
topology: v6e:2x2x1
jax: 0.10.0
libtpu: 0.0.40
codegen_flags: <defaults>
</compile_context>

<pallas_src>
import functools
import math

import numpy as np
import jax
import jax.numpy as jnp
from jax.experimental import pallas as pl
from jax.experimental.pallas import tpu as pltpu


# ----------------------------------------------------------------------------
# Parameter/buffer setup (plain numpy/JAX glue) -- mirrors nn.Module.__init__
# ----------------------------------------------------------------------------
def build_pe_table(d_model: int, max_len: int, negative: bool = False) -> jnp.ndarray:
    """Sinusoidal positional-encoding table; (rows, d_model), rows = max_len or 2*max_len."""
    if negative:
        position = np.arange(-max_len, max_len, dtype=np.float32)[:, None]
        rows = 2 * max_len
    else:
        position = np.arange(0, max_len, dtype=np.float32)[:, None]
        rows = max_len
    div_term = np.exp(
        np.arange(0, d_model, 2, dtype=np.float32) * (-math.log(10000.0) / d_model)
    )
    pe = np.zeros((rows, d_model), dtype=np.float32)
    pe[:, 0::2] = np.sin(position * div_term)
    pe[:, 1::2] = np.cos(position * div_term)
    return jnp.asarray(pe)


# ----------------------------------------------------------------------------
# Tiling policy
# ----------------------------------------------------------------------------
_TARGET_TILE_BYTES = 4 * 1024 * 1024      # ~4 MiB x-tiles (good on v5e/v6e/v7x)
_MAX_TILE_BYTES = 8 * 1024 * 1024         # hard per-tile cap
_PE_RESIDENT_MAX_BYTES = 2 * 1024 * 1024  # keep pe VMEM-resident below this
_MIN_PALLAS_ELEMS = 16 * 1024             # tiny tensors: XLA fuses the add for free
_VMEM_LIMIT_BYTES = 48 * 1024 * 1024      # < v7x 64 MiB physical; v5e/v6e have 128 MiB


def _cdiv(a: int, b: int) -> int:
    return -(-a // b)


def _rdn(x: int, m: int) -> int:
    return (x // m) * m


def _rup(x: int, m: int) -> int:
    return _cdiv(x, m) * m


def _sublane_pack(dtype) -> int:
    """Sublane packing of the second-minor dim: 8 (f32), 16 (bf16/f16), 32 (int8/fp8)."""
    return 8 * max(1, 4 // jnp.dtype(dtype).itemsize)


def _pick_tile(total: int, row_bytes: int, align: int, target_bytes: int) -> int:
    """Tile size in rows: an `align` multiple (or the full extent when total<=align),
    ~target_bytes per tile, and >= 2 grid steps (preferring an even count, ~4 steps)
    whenever the extent allows.  A 1-step grid has zero DMA/compute overlap and pins
    the whole call to a single v7x TensorCore."""
    if total <= align:
        return total
    steps = lambda t: _cdiv(total, t)
    ideal = max(align, _rdn(target_bytes // max(1, row_bytes), align))
    quarter = max(align, _rdn(total // 4, align))     # aim for ~4 grid steps
    tile = min(ideal, quarter)
    # Prefer an even step count (v7x shards a "parallel" axis across 2 TensorCores),
    # but only when the tile shrink is modest (<= 25%).
    if steps(tile) % 2 == 1 and tile >= 4 * align and steps(tile - align) % 2 == 0:
        tile -= align
    return tile


# ----------------------------------------------------------------------------
# Pallas kernels (pure VPU broadcast-add; memory-bound)
# ----------------------------------------------------------------------------
def _seq_pe_resident_kernel(x_ref, pe_ref, o_ref, *, ts):
    # x: (ts, B, D); pe: (S_pad, D) VMEM-resident (constant block -> DMA'd once).
    start = pl.multiple_of(pl.program_id(0) * ts, ts)
    pe = pe_ref[pl.ds(start, ts), :]
    o_ref[...] = x_ref[...] + pe[:, None, :]


def _seq_pe_streamed_kernel(x_ref, pe_ref, o_ref):
    # x: (ts, B, td); pe: (ts, td) -> broadcast over the batch (middle) axis.
    o_ref[...] = x_ref[...] + pe_ref[...][:, None, :]


def _row_kernel(x_ref, pe_ref, o_ref):
    # x: (tb, tc); pe: (1, tc) -> broadcast over the batch (sublane) axis.
    o_ref[...] = x_ref[...] + pe_ref[...]


def _compiler_params(sem):
    return pltpu.CompilerParams(
        dimension_semantics=sem, vmem_limit_bytes=_VMEM_LIMIT_BYTES
    )


# ----------------------------------------------------------------------------
# Pallas wrappers
# ----------------------------------------------------------------------------
def _add_pe_seq_first(x, pe_slice, donate_x=False):
    """x: (S, B, D); pe_slice: (S, D) already cast to x.dtype."""
    S, B, D = x.shape
    itemsize = x.dtype.itemsize
    pack = _sublane_pack(x.dtype)
    D_pad = _rup(D, 128)
    B_pad = _rup(B, pack)
    eff_row = B_pad * D_pad * itemsize        # VMEM bytes of one S-row (padded layout)
    aliases = {0: 0} if donate_x else {}

    if pack * eff_row <= _TARGET_TILE_BYTES:
        # ---- 1-D grid over the sequence axis --------------------------------
        ts = _pick_tile(S, eff_row, pack, _TARGET_TILE_BYTES)
        ns = _cdiv(S, ts)
        pe_bytes = _rup(S, pack) * D_pad * itemsize
        if pe_bytes <= _PE_RESIDENT_MAX_BYTES:
            # pe DMA'd once (constant block index), sliced in-kernel per step.
            S_pad = ns * ts
            pe_arg = (pe_slice if S_pad == S
                      else jnp.pad(pe_slice, ((0, S_pad - S), (0, 0))))
            kernel = functools.partial(_seq_pe_resident_kernel, ts=ts)
            pe_spec = pl.BlockSpec((S_pad, D), lambda i: (0, 0))
        else:
            pe_arg = pe_slice
            kernel = _seq_pe_streamed_kernel
            pe_spec = pl.BlockSpec((ts, D), lambda i: (i, 0))
        return pl.pallas_call(
            kernel,
            out_shape=jax.ShapeDtypeStruct((S, B, D), x.dtype),
            grid=(ns,),
            in_specs=[pl.BlockSpec((ts, B, D), lambda i: (i, 0, 0)), pe_spec],
            out_specs=pl.BlockSpec((ts, B, D), lambda i: (i, 0, 0)),
            compiler_params=_compiler_params(("parallel",)),
            input_output_aliases=aliases,
        )(x, pe_arg)

    # ---- 2-D grid over (sequence, feature) for very wide rows ---------------
    ts = min(S, pack)
    td = max(128, _rdn(_TARGET_TILE_BYTES // max(1, ts * B_pad * itemsize), 128))
    td = min(td, D)
    if ts * B_pad * _rup(td, 128) * itemsize > _MAX_TILE_BYTES:
        # Pathological (enormous batch with tiny d_model): let XLA fuse the add.
        return x + pe_slice[:, None, :]
    return pl.pallas_call(
        _seq_pe_streamed_kernel,
        out_shape=jax.ShapeDtypeStruct((S, B, D), x.dtype),
        grid=(_cdiv(S, ts), _cdiv(D, td)),
        in_specs=[pl.BlockSpec((ts, B, td), lambda i, j: (i, 0, j)),
                  pl.BlockSpec((ts, td), lambda i, j: (i, j))],
        out_specs=pl.BlockSpec((ts, B, td), lambda i, j: (i, 0, j)),
        compiler_params=_compiler_params(("parallel", "parallel")),
        input_output_aliases=aliases,
    )(x, pe_slice)


def _add_pe_batch_first(x, pe_slice, donate_x=False):
    """x: (B, S, D); pe_slice: (S, D) already cast to x.dtype.  No HBM transposes:
    trailing (S, D) dims are flattened (contiguous, free) for lane-dense stores."""
    B, S, D = x.shape
    itemsize = x.dtype.itemsize
    pack = _sublane_pack(x.dtype)
    C = S * D
    x2 = x.reshape(B, C)                      # bit-identical reshape, no HBM movement
    pe2 = pe_slice.reshape(1, C)
    C_pad = _rup(C, 128)
    B_pad = _rup(B, pack)
    row_eff = C_pad * itemsize                # one padded batch row in VMEM
    aliases = {0: 0} if donate_x else {}

    if B > pack and pack * row_eff <= _TARGET_TILE_BYTES:
        # Rows fit: tile the batch axis only; pe (1, C) has a constant block index
        # along the grid, so it is DMA'd once and stays VMEM-resident.
        tb = _pick_tile(B, row_eff, pack, _TARGET_TILE_BYTES)
        tc = C
    elif B <= pack:
        # Batch too small to split on sublanes: tile the flattened lane axis so
        # the grid still has >= 2 pipelined steps (C axis is outermost, so pe is
        # only re-fetched once per C-block -> extra read bounded by 1/B).
        tb = B
        tc = _pick_tile(C, B_pad * itemsize, 128, _TARGET_TILE_BYTES)
    else:
        # Wide rows and a large batch: tile both axes.
        tb = pack
        tc = _pick_tile(C, pack * itemsize, 128, _TARGET_TILE_BYTES)

    grid = (_cdiv(C, tc), _cdiv(B, tb))       # C outermost -> minimal pe re-fetches
    out2 = pl.pallas_call(
        _row_kernel,
        out_shape=jax.ShapeDtypeStruct((B, C), x.dtype),
        grid=grid,
        in_specs=[pl.BlockSpec((tb, tc), lambda j, i: (i, j)),
                  pl.BlockSpec((1, tc), lambda j, i: (0, j))],
        out_specs=pl.BlockSpec((tb, tc), lambda j, i: (i, j)),
        compiler_params=_compiler_params(("parallel", "parallel")),
        input_output_aliases=aliases,
    )(x2, pe2)
    return out2.reshape(B, S, D)


# ----------------------------------------------------------------------------
# Module-equivalent forward pass
# ----------------------------------------------------------------------------
def positional_encoding_forward(
    x: jnp.ndarray,
    pe: jnp.ndarray,
    *,
    max_len: int,
    hist_frames: int = 0,
    batch_first: bool = False,
    negative: bool = False,
    donate_x: bool = False,
) -> jnp.ndarray:
    if not negative:
        assert hist_frames == 0
        first = 0
    else:
        first = max_len - hist_frames

    seq_len = x.shape[1] if batch_first else x.shape[0]
    pe_slice = jax.lax.slice_in_dim(pe, first, first + seq_len, axis=0)
    # NOTE: pe is cast to x.dtype (PyTorch's fp32 buffer would promote bf16 x to
    # fp32); precision delta of a positional add is negligible, halves pe DMA.
    pe_slice = pe_slice.astype(x.dtype)

    # Tiny problem: kernel-launch + per-step overhead dwarfs the work; XLA fuses it.
    if x.size < _MIN_PALLAS_ELEMS:
        if batch_first:
            return x + pe_slice[None, :, :]
        return x + pe_slice[:, None, :]

    if batch_first:
        out = _add_pe_batch_first(x, pe_slice, donate_x)
    else:
        out = _add_pe_seq_first(x, pe_slice, donate_x)

    # nn.Dropout in eval mode is identity.
    return out


# ----------------------------------------------------------------------------
# Demo / self-check
# ----------------------------------------------------------------------------
if __name__ == "__main__":
    d_model = 128
    max_len = 256
    seq = 64
    batch = 4

    key = jax.random.PRNGKey(0)
    k1, k2 = jax.random.split(key)

    pe_pos = build_pe_table(d_model, max_len, negative=False)
    pe_neg = build_pe_table(d_model, max_len, negative=True)

    # --- seq-first (batch_first=False), positive encodings -------------------
    x_sf = jax.random.normal(k1, (seq, batch, d_model), dtype=jnp.float32)
    out_sf = positional_encoding_forward(
        x_sf, pe_pos, max_len=max_len, hist_frames=0, batch_first=False, negative=False
    )
    out_sf = jax.block_until_ready(out_sf)
    ref_sf = x_sf + pe_pos[:seq][:, None, :]
    assert out_sf.shape == x_sf.shape
    assert np.allclose(np.asarray(out_sf), np.asarray(ref_sf), atol=1e-6), \
        "seq-first mismatch vs reference"

    # --- batch-first (no transposes), negative encodings with hist_frames ----
    hist = 3
    x_bf = jax.random.normal(k2, (batch, seq, d_model), dtype=jnp.float32)
    out_bf = positional_encoding_forward(
        x_bf, pe_neg, max_len=max_len, hist_frames=hist, batch_first=True, negative=True
    )
    out_bf = jax.block_until_ready(out_bf)
    first = max_len - hist
    ref_bf = x_bf + pe_neg[first:first + seq][None, :, :]
    assert out_bf.shape == x_bf.shape
    assert np.allclose(np.asarray(out_bf), np.asarray(ref_bf), atol=1e-6), \
        "batch-first mismatch vs reference"

    print("KERNEL_OK")
</pallas_src>

<mosaic_0001>
module attributes {stable_mosaic.version = 11 : i64} {
  func.func @_seq_pe_resident_kernel(%arg0: i32, %arg1: memref<16x4x128xf32, #tpu.memory_space<vmem>>, %arg2: memref<64x128xf32, #tpu.memory_space<vmem>>, %arg3: memref<16x4x128xf32, #tpu.memory_space<vmem>>) attributes {dimension_semantics = [#tpu.dimension_semantics<parallel>], iteration_bounds = array<i64: 4>, scalar_prefetch = 0 : i64, scratch_operands = 0 : i64, tpu.core_type = #tpu.core_type<tc>, window_params = [{transform_indices = @transform_0, window_bounds = array<i64: 16, 4, 128>}, {pipeline_mode = #tpu.pipeline_mode<synchronous>, transform_indices = @transform_1, window_bounds = array<i64: 64, 128>}, {transform_indices = @transform_2, window_bounds = array<i64: 16, 4, 128>}]} {
    %c16_i32 = arith.constant 16 : i32
    %0 = arith.muli %arg0, %c16_i32 : i32
    %1 = tpu.assume_multiple %0, 16 : i32
    %2 = arith.index_cast %1 : i32 to index
    %c0 = arith.constant 0 : index
    %3 = vector.load %arg2[%2, %c0] : memref<64x128xf32, #tpu.memory_space<vmem>>, vector<16x128xf32>
    %c0_0 = arith.constant 0 : index
    %c0_1 = arith.constant 0 : index
    %c0_2 = arith.constant 0 : index
    %4 = vector.load %arg1[%c0_0, %c0_1, %c0_2] : memref<16x4x128xf32, #tpu.memory_space<vmem>>, vector<16x4x128xf32>
    %5 = vector.shape_cast %3 : vector<16x128xf32> to vector<16x1x128xf32>
    %6 = vector.broadcast %5 : vector<16x1x128xf32> to vector<16x4x128xf32>
    %7 = arith.addf %4, %6 : vector<16x4x128xf32>
    %c0_3 = arith.constant 0 : index
    %c0_4 = arith.constant 0 : index
    %c0_5 = arith.constant 0 : index
    %8 = vector.load %arg3[%c0_3, %c0_4, %c0_5] : memref<16x4x128xf32, #tpu.memory_space<vmem>>, vector<16x4x128xf32>
    tpu.vector_store %arg3[%c0_3, %c0_4, %c0_5], %7 {strides = array<i32>} : memref<16x4x128xf32, #tpu.memory_space<vmem>>, vector<16x4x128xf32>,
    return
  }
  func.func @transform_0(%arg0: i32) -> (i32, i32, i32) {
    %c0_i32 = arith.constant 0 : i32
    %c0_i32_0 = arith.constant 0 : i32
    %c0_i32_1 = arith.constant 0 : i32
    return %arg0, %c0_i32, %c0_i32_0 : i32, i32, i32
  }
  func.func @transform_1(%arg0: i32) -> (i32, i32) {
    %c0_i32 = arith.constant 0 : i32
    %c0_i32_0 = arith.constant 0 : i32
    %c0_i32_1 = arith.constant 0 : i32
    return %c0_i32, %c0_i32_0 : i32, i32
  }
  func.func @transform_2(%arg0: i32) -> (i32, i32, i32) {
    %c0_i32 = arith.constant 0 : i32
    %c0_i32_0 = arith.constant 0 : i32
    %c0_i32_1 = arith.constant 0 : i32
    return %arg0, %c0_i32, %c0_i32_0 : i32, i32, i32
  }
}

</mosaic_0001>

<bundles_post_ra>
// kernel: tpu_custom_call.1
= control target key start
LH: loop header
LB: loop body
LE: loop exit
PB: predicated region body
PF: predicated region fallthrough
CT: control target
= control target key end

     0   :  { %7 = vsyncpa [#allocation3], 0  ;;  %s993_s0 = inlined_call_operand.hbm [shape: f32[64,4,128], index: 0, kind: input, shape index: {}]   ;;  %s994_s1 = inlined_call_operand.hbm [shape: f32[64,128], index: 1, kind: input, shape index: {}]   ;;  %s995_s2 = inlined_call_operand.hbm [shape: f32[64,4,128], index: 2, kind: output, shape index: {}]  }
   0x1   :  { %9 = vsyncpa [#allocation3 + $0x1], 0 }
   0x2   :  { %10 = vsyncpa [#allocation6], 0 }
   0x3   :  { %11 = vsyncpa [#allocation4], 0 }
   0x4   :  { %13 = vsyncpa [#allocation4 + $0x1], 0  ;;  %s744_s9 = smov 0   ;;  %s746_s10 = smov 0  }
   0x5   :  { %s748_s11 = smov 0   ;;  %s750_s12 = smov 0  }
   0x6 LB: > { %s765_s13 = sadd.s32 4294967295, %s717_s12   ;;  %s510_s14 = sadd.s32 4294967294, %s717_s12   ;;  %s717_s12 = sphi %s750_s12, %s1016_s12   ;;  %s713_s11 = sphi %s748_s11, %s1015_s11   ;;  %s709_s10 = sphi %s746_s10, %s1014_s10   ;;  %s705_s9 = sphi %s744_s9, %s1013_s9  }
   0x7   : > { %p39_p0 = scmp.ne.s32.totalorder %s709_s10, %s705_s9  ;;  %p996_p1 = scmp.eq.s32.totalorder %s765_s13, 0 }
   0x8   : > { %p90_p3 = scmp.eq.s32.totalorder %s510_s14, 3  ;;  %p511_p5 = scmp.ge.s32.totalorder %s717_s12, 1 }
   0x9   : > { %p774_p4 = por %p996_p1, %p39_p0  ;;  %p97_p7 = scmp.lt.s32.totalorder %s717_s12, 5 }
   0xa   : > { %p779_p6 = por %p90_p3, %p39_p0  ;;  %s719_s18 = smov [#allocation5]  }
   0xb   : > { %s1000_s15 = scalar_select %p774_p4, 1, 0 }
   0xc   : > { %s1001_s16 = scalar_select %p779_p6, 1, 0 }
   0xd   : > { %p784_p8 = pnand %p511_p5, %p97_p7  ;;  %s109_s19 = sshll.u32 %s719_s18, 4  ;;  %s110_s19 = int_to_ptr.vmem [resolvable:$true] %s109_s19 }
   0xe   : > { %s797_s21 = sadd.s32 1, %s717_s12   ;;  %s26_s22 = sadd.s32 1, %s713_s11 }
   0xf   : > { %s1002_s17 = scalar_select %p784_p8, 1, 0 }
  0x10   : > { %p537_p9 = pneg %p784_p8  ;;  %s23_s23 = ssub.s32 %s717_s12, %s797_s21 }
  0x11   : > { %s606_s24 = scalar_lea.vmem %s110_s19, 1024  ;;  %p614_p3 = scmp.lt.s32.totalorder %s110_s19, %s110_s19 }
  0x12   : > { %p792_p10 = pnand %p537_p9, %p996_p1  ;;  %p607_p12 = scmp.ne.s32.totalorder %s110_s19, %s606_s24 }
  0x13   : > { %p615_p5 = scmp.lt.s32.totalorder %s606_s24, %s606_s24 }
  0x14   : > { %p597_p11 = pneg %p792_p10 }
  0x15   : > { %p616_p7 = por %p615_p5, %p614_p3 }
  0x16   : > { %p609_p13 = pnand %p607_p12, %p597_p11 }
  0x18   : > { %p610_p0 = pneg %p609_p13 }
  0x1a   : > { %p617_p2 = pnand %p616_p7, %p610_p0 }
  0x1c   : > { %620 = shalt.err (!%p617_p2)
}
  0x1d   : > { %s720_s25 = smov 128   ;;  %s721_s26 = smov 8  }
  0x1e   : > { %540 = dma.hbm_to_vmem [thread:$0]  (!%p792_p10), %s994_s1, 1024, %s110_s19, [#allocation6], %s720_s25, %s720_s25, %s721_s26  }
  0x1f   : > { %p24_p9 = scmp.eq.s32.totalorder %s23_s23, 0  ;;  %p33_p11 = scmp.ne.s32.totalorder %s713_s11, %s709_s10 }
  0x20   : > { %p34_p12 = scmp.eq.s32.totalorder %s717_s12, 0  ;;  %p550_p2 = scmp.lt.s32.totalorder %s717_s12, 4 }
  0x21   : > { %s814_s29 = scalar_select %p24_p9, %s713_s11, %s26_s22  }
  0x22   : > { %p35_p13 = por %p34_p12, %p33_p11  ;;  %p1004_p0 = scmp.eq.s32.totalorder %s765_s13, 3 }
  0x23   : > { %s123_s3 = sand.u32 1, %s713_s11   ;;  %s527_s4 = sshll.u32 %s717_s12, 10 }
  0x24   : > { %p818_p3 = por %p1004_p0, %p33_p11  ;;  %s514_s5 = sshll.u32 %s123_s3, 6 }
  0x25   : > { %s827_s8 = scalar_lea.hbm %s993_s0, %s527_s4  ;;  %s127_s14 = scalar_lea.vmem [#allocation2], %s514_s5 }
  0x26   : > { %s1005_s30 = scalar_select %p818_p3, 1, 0 }
  0x27   : > { %s134_s18 = sshll.u32 %s127_s14, 4  ;;  %p829_p10 = pnand %p550_p2, %p35_p13  ;;  %s833_s18 = int_to_ptr.vmem [resolvable:$true] %s134_s18 }
  0x28   : > { %s835_s20 = scalar_lea.sflag [#allocation3], %s123_s3  ;;  %s621_s22 = scalar_lea.hbm %s827_s8, 1024 }
  0x29   : > { %p622_p5 = scmp.ne.s32.totalorder %s827_s8, %s621_s22  ;;  %p623_p7 = pneg %p829_p10 }
  0x2a   : > { %s626_s25 = scalar_lea.hbm %s993_s0, 4096  ;;  %p627_p12 = scmp.lt.s32.totalorder %s827_s8, %s993_s0 }
  0x2b   : > { %p624_p9 = pnand %p623_p7, %p622_p5  ;;  %p628_p2 = scmp.lt.s32.totalorder %s626_s25, %s621_s22 }
  0x2d   : > { %p625_p11 = pneg %p624_p9  ;;  %p629_p13 = por %p628_p2, %p627_p12 }
  0x2f   : > { %p630_p0 = pnand %p629_p13, %p625_p11 }
  0x31   : > { %633 = shalt.err (!%p630_p0)
}
  0x32   : > { %s634_s28 = scalar_lea.vmem %s833_s18, 1024  ;;  %s722_s3 = smov [#allocation2]  }
  0x33   : > { %p635_p1 = scmp.ne.s32.totalorder %s833_s18, %s634_s28  ;;  %s639_s4 = sshll.u32 %s722_s3, 4  ;;  %s640_s4 = int_to_ptr.vmem [resolvable:$false] %s639_s4 }
  0x34   : > { %s641_s5 = scalar_lea.vmem %s640_s4, 2048  ;;  %p642_p9 = scmp.lt.s32.totalorder %s833_s18, %s640_s4 }
  0x35   : > { %p637_p6 = pnand %p635_p1, %p623_p7  ;;  %p643_p3 = scmp.lt.s32.totalorder %s641_s5, %s634_s28 }
  0x37   : > { %p638_p5 = pneg %p637_p6  ;;  %p644_p4 = por %p643_p3, %p642_p9 }
  0x39   : > { %p645_p8 = pnand %p644_p4, %p638_p5 }
  0x3b   : > { %648 = shalt.err (!%p645_p8)
}
  0x3c   : > { %s723_s6 = smov 64   ;;  %s724_s7 = smov 4  }
  0x3d   : > { %544 = dma.hbm_to_vmem [thread:$0]  (!%p829_p10), %s827_s8, 1024, %s833_s18, %s835_s20, %s723_s6, %s723_s6, %s724_s7  }
  0x3e   : > { %p1007_p1 = scmp.ne.s32.totalorder %s1002_s17, 0 }
  0x3f   : > { %s859_s14 = sand.u32 (!%p1007_p1), 1, %s709_s10   ;;  %p1008_p4 = scmp.ne.s32.totalorder (!%p1007_p1), %s1000_s15, 0 }
  0x40   : > { %146 = sbr.rel (%p1007_p1) target bundleno = 114 (0x72), region = 28  ;;  %s518_s22 = sshll.u32 (!%p1007_p1), %s859_s14, 6 }
  0x41   : > { %s149_s23 = scalar_lea.sflag (!%p1007_p1), [#allocation3], %s859_s14  ;;  %s865_s24 = scalar_lea.vmem (!%p1007_p1), [#allocation2], %s518_s22 }
  0x45   : > { %692 = dma.done.wait (%p1008_p4), %s149_s23, 1024  }
  0x46   : > { %694 = vsyncadd (%p1008_p4), %s149_s23, 4294966272  ;;  %p1009_p6 = scmp.eq.s32.totalorder %s765_s13, 0 }
  0x48   : > { %696 = dma.done.wait (%p1009_p6), [#allocation6], 1024   ;;  %p1010_p8 = pmov %p1009_p6 }
  0x49   : > { %v205_v0 = vlaneseq  ;;  %s521_s17 = sshll.u32 %s765_s13, 4  ;;  %v725_v1 = vmov 1966171168   ;;  %v183_v14 = vld [vmem:[%s865_s24] sm:$0xf]  ;;  %s902_s15 = scalar_lea.vmem [#allocation7], %s518_s22 }
  0x4a   : > { %698 = vsyncadd (%p1010_p8), [#allocation6], 4294966272  ;;  %v203_v2 = vunpack.c.l.s4 %v725_v1  ;;  %s180_s8 = scalar_lea.vmem [#allocation5], %s521_s17  ;;  %v184_v21 = vld [vmem:[%s865_s24 + $0x4] sm:$0xf]  ;;  %s528_s18 = sshll.u32 %s765_s13, 10 }
  0x4b   : > { %v206_v3 = vshrl.u32 %v205_v0, 7  ;;  %v181_v6 = vld [vmem:[%s180_s8] sm:$0xff]  ;;  %v182_v13 = vld [vmem:[%s180_s8 + $0x8] sm:$0xff]  ;;  %v187_v31 = vld [vmem:[%s865_s24 + $0x10] sm:$0xf]  ;;  %s425_s19 = sshll.u32 %s902_s15, 4  ;;  %s946_s26 = scalar_lea.hbm %s995_s2, %s528_s18  ;;  %s948_s19 = int_to_ptr.vmem [resolvable:$true] %s425_s19 }
  0x4c   : > { %v204_v4 = vunpack.c.0.s8 %v203_v2  ;;  %v201_v9 = vcombine.high %v181_v6, %v181_v6  ;;  %v250_v16 = vcombine.high %v182_v13, %v182_v13  ;;  %v185_v22 = vld [vmem:[%s865_s24 + $0x8] sm:$0xf]  ;;  %v186_v32 = vld [vmem:[%s865_s24 + $0xc] sm:$0xf]  ;;  %v191_v36 = vld [vmem:[%s865_s24 + $0x20] sm:$0xf] }
  0x4d   : > { %v879_v8 = vsub.s32 0, %v206_v3  ;;  %v188_v41 = vld [vmem:[%s865_s24 + $0x14] sm:$0xf]  ;;  %v189_v42 = vld [vmem:[%s865_s24 + $0x18] sm:$0xf]  ;;  %s412_s13 = scalar_lea.sflag [#allocation4], %s859_s14 }
  0x4e   : > { %v876_v5 = vsub.s32 %v204_v4, %v206_v3  ;;  %v192_v48 = vld [vmem:[%s865_s24 + $0x24] sm:$0xf]  ;;  %v190_v50 = vld [vmem:[%s865_s24 + $0x1c] sm:$0xf]  ;;  %v193_v57 = vld [vmem:[%s865_s24 + $0x28] sm:$0xf] }
  0x4f   : > { %v194_v61 = vld [vmem:[%s865_s24 + $0x2c] sm:$0xf]  ;;  %v195_v2 = vld [vmem:[%s865_s24 + $0x30] sm:$0xf]  ;;  %s649_s27 = scalar_lea.vmem %s948_s19, 1024  ;;  %p1011_p10 = scmp.ne.s32.totalorder %s1005_s30, 0 }
  0x50   : > { %v208_v7 = vrot.slane %v181_v6, %v876_v5  ;;  %v215_v12 = vrot.slane %v201_v9, %v876_v5  ;;  %v257_v15 = vrot.slane %v182_v13, %v876_v5  ;;  %v264_v26 = vrot.slane %v250_v16, %v876_v5  ;;  %p650_p3 = scmp.ne.s32.totalorder %s948_s19, %s649_s27  ;;  %s726_s28 = smov [#allocation7]  }
  0x51   : > { %s653_s3 = sshll.u32 %s726_s28, 4  ;;  %s654_s3 = int_to_ptr.vmem [resolvable:$false] %s653_s3 }
  0x52   : > { %v224_v10 = vrot.slane %v208_v7, %v876_v5  ;;  %v216_v11 = vcombine.high %v208_v7, %v208_v7  ;;  %v231_v20 = vrot.slane %v215_v12, %v876_v5  ;;  %v217_v23 = vcombine.high %v215_v12, %v215_v12  ;;  %p651_p7 = pnand %p650_p3, %p1011_p10  ;;  %s655_s4 = scalar_lea.vmem %s654_s3, 2048 }
  0x53   : > { %v273_v24 = vrot.slane %v257_v15, %v876_v5  ;;  %v265_v25 = vcombine.high %v257_v15, %v257_v15  ;;  %v280_v62 = vrot.slane %v264_v26, %v876_v5  ;;  %v266_v63 = vcombine.high %v264_v26, %v264_v26  ;;  %p656_p12 = scmp.lt.s32.totalorder %s948_s19, %s654_s3  ;;  %p657_p2 = scmp.lt.s32.totalorder %s655_s4, %s649_s27 }
  0x54   : > { %v302_v17 = vrot.slane %v224_v10, %v879_v8  ;;  %v238_v18 = vrot.slane %v216_v11, %v876_v5  ;;  %v246_v19 = vcombine.high %v224_v10, %v224_v10  ;;  %v318_v33 = vrot.slane %v231_v20, %v879_v8  ;;  %v196_v10 = vld [vmem:[%s865_s24 + $0x34] sm:$0xf]  ;;  %v197_v11 = vld [vmem:[%s865_s24 + $0x38] sm:$0xf]  ;;  %p652_p11 = pneg %p651_p7 }
  0x55   : > { %v245_v34 = vrot.slane %v217_v23, %v876_v5  ;;  %v247_v35 = vcombine.high %v231_v20, %v231_v20  ;;  %v334_v37 = vrot.slane %v273_v24, %v879_v8  ;;  %v287_v43 = vrot.slane %v265_v25, %v876_v5  ;;  %p658_p13 = por %p657_p2, %p656_p12 }
  0x56   : > { %v379_v27 = vadd.f32 %v302_v17, %v183_v14  ;;  %v306_v28 = vrot.slane %v238_v18, %v879_v8  ;;  %v310_v29 = vrot.slane %v246_v19, %v879_v8  ;;  %v248_v30 = vcombine.high %v238_v18, %v238_v18 }
  0x57   : > { %v383_v44 = vadd.f32 %v318_v33, %v187_v31  ;;  %v322_v45 = vrot.slane %v245_v34, %v879_v8  ;;  %v326_v46 = vrot.slane %v247_v35, %v879_v8  ;;  %v249_v47 = vcombine.high %v245_v34, %v245_v34  ;;  %p659_p0 = pnand %p658_p13, %p652_p11 }
  0x58   : > { %395 = vst [vmem:[%s902_s15] sm:$0xf] %v379_v27  ;;  %v380_v38 = vadd.f32 %v306_v28, %v184_v21  ;;  %v381_v39 = vadd.f32 %v310_v29, %v185_v22  ;;  %v314_v40 = vrot.slane %v248_v30, %v879_v8  ;;  %v387_v51 = vadd.f32 %v334_v37, %v191_v36 }
  0x59   : > { %v338_v52 = vrot.slane %v287_v43, %v879_v8  ;;  %v295_v53 = vcombine.high %v273_v24, %v273_v24  ;;  %399 = vst [vmem:[%s902_s15 + $0x10] sm:$0xf] %v383_v44  ;;  %v384_v54 = vadd.f32 %v322_v45, %v188_v41  ;;  %v385_v55 = vadd.f32 %v326_v46, %v189_v42 }
  0x5a   : > { %396 = vst [vmem:[%s902_s15 + $0x4] sm:$0xf] %v380_v38  ;;  %397 = vst [vmem:[%s902_s15 + $0x8] sm:$0xf] %v381_v39  ;;  %v382_v49 = vadd.f32 %v314_v40, %v186_v32  ;;  %v330_v56 = vrot.slane %v249_v47, %v879_v8  ;;  %v297_v58 = vcombine.high %v287_v43, %v287_v43 }
  0x5b   : > { %403 = vst [vmem:[%s902_s15 + $0x20] sm:$0xf] %v387_v51  ;;  %v388_v59 = vadd.f32 %v338_v52, %v192_v48  ;;  %v342_v60 = vrot.slane %v295_v53, %v879_v8  ;;  %400 = vst [vmem:[%s902_s15 + $0x14] sm:$0xf] %v384_v54  ;;  %v350_v4 = vrot.slane %v280_v62, %v879_v8 }
  0x5c   : > { %398 = vst [vmem:[%s902_s15 + $0xc] sm:$0xf] %v382_v49  ;;  %401 = vst [vmem:[%s902_s15 + $0x18] sm:$0xf] %v385_v55  ;;  %v386_v0 = vadd.f32 %v330_v56, %v190_v50  ;;  %v346_v1 = vrot.slane %v297_v58, %v879_v8  ;;  %v294_v6 = vrot.slane %v266_v63, %v876_v5  ;;  %v198_v5 = vld [vmem:[%s865_s24 + $0x3c] sm:$0xf] }
  0x5d   : > { %404 = vst [vmem:[%s902_s15 + $0x24] sm:$0xf] %v388_v59  ;;  %v389_v3 = vadd.f32 %v342_v60, %v193_v57  ;;  %v296_v7 = vcombine.high %v280_v62, %v280_v62  ;;  %v391_v12 = vadd.f32 %v350_v4, %v195_v2 }
  0x5e   : > { %402 = vst [vmem:[%s902_s15 + $0x1c] sm:$0xf] %v386_v0  ;;  %v390_v9 = vadd.f32 %v346_v1, %v194_v61  ;;  %v354_v13 = vrot.slane %v294_v6, %v879_v8  ;;  %v298_v15 = vcombine.high %v294_v6, %v294_v6 }
  0x5f   : > { %405 = vst [vmem:[%s902_s15 + $0x28] sm:$0xf] %v389_v3  ;;  %v358_v14 = vrot.slane %v296_v7, %v879_v8  ;;  %407 = vst [vmem:[%s902_s15 + $0x30] sm:$0xf] %v391_v12 }
  0x60   : > { %406 = vst [vmem:[%s902_s15 + $0x2c] sm:$0xf] %v390_v9  ;;  %v392_v16 = vadd.f32 %v354_v13, %v196_v10  ;;  %v362_v18 = vrot.slane %v298_v15, %v879_v8 }
  0x61   : > { %v393_v17 = vadd.f32 %v358_v14, %v197_v11 }
  0x62   : > { %408 = vst [vmem:[%s902_s15 + $0x34] sm:$0xf] %v392_v16  ;;  %v394_v19 = vadd.f32 %v362_v18, %v198_v5 }
  0x63   : > { %409 = vst [vmem:[%s902_s15 + $0x38] sm:$0xf] %v393_v17 }
  0x64   : > { %410 = vst [vmem:[%s902_s15 + $0x3c] sm:$0xf] %v394_v19 }
  0x65   : > { %662 = shalt.err (!%p659_p0)
}
  0x66   : > { %s663_s5 = scalar_lea.hbm %s946_s26, 1024  ;;  %s667_s22 = scalar_lea.hbm %s995_s2, 4096 }
  0x67   : > { %p664_p5 = scmp.ne.s32.totalorder %s946_s26, %s663_s5  ;;  %p668_p4 = scmp.lt.s32.totalorder %s946_s26, %s995_s2 }
  0x68   : > { %p669_p6 = scmp.lt.s32.totalorder %s667_s22, %s663_s5 }
  0x69   : > { %p665_p9 = pnand %p664_p5, %p1011_p10 }
  0x6a   : > { %p670_p8 = por %p669_p6, %p668_p4 }
  0x6b   : > { %p666_p1 = pneg %p665_p9 }
  0x6d   : > { %p671_p3 = pnand %p670_p8, %p666_p1 }
  0x6f   : > { %674 = shalt.err (!%p671_p3)
}
  0x70   : > { %s727_s17 = smov 64   ;;  %s728_s8 = smov 4  }
  0x71   : > { %535 = dma.vmem_to_hbm [thread:$0]  (%p1011_p10), %s948_s19, 1024, %s946_s26, %s412_s13, %s727_s17, %s727_s17, %s728_s8  }
  0x72 PF: > { %p552_p7 = scmp.ge.s32.totalorder %s717_s12, 2  ;;  %s440_s15 = sand.u32 1, %s705_s9  }
  0x73   : > { %p1012_p11 = scmp.ne.s32.totalorder %s1001_s16, 0  ;;  %s441_s18 = scalar_lea.sflag [#allocation4], %s440_s15 }
  0x75   : > { %p546_p12 = pnand %p552_p7, %p1012_p11 }
  0x77   : > { %p547_p2 = pneg %p546_p12 }
  0x79   : > { %700 = dma.done.wait (%p547_p2), %s441_s18, 1024  }
  0x7a   : > { %702 = vsyncadd (%p547_p2), %s441_s18, 4294966272  ;;  %p16_p13 = scmp.ge.s32.totalorder %s797_s21, 6   ;;  %s1013_s9 = smov %s709_s10 }
  0x7b   : > { %s1014_s10 = smov %s713_s11  ;;  %s1015_s11 = smov %s814_s29 }
  0x7c   : > { %s1016_s12 = smov %s797_s21  ;;  %18 = sbr.rel (!%p16_p13) target bundleno = 6 (0x6), region = 78 }
  0x81   :  { %446 = vsyncpa [#allocation3], 1 }
  0x82   :  { %448 = vsyncpa [#allocation3 + $0x1], 1 }
  0x83   :  { %449 = vsyncpa [#allocation6], 1 }
  0x84   :  { %450 = vsyncpa [#allocation4], 1 }
  0x85   :  { %452 = vsyncpa [#allocation4 + $0x1], 1 }

</bundles_post_ra>
